<compile_context>
chip_gen: v7x
topology: tpu7x:2x2x1
jax: 0.10.0
libtpu: 0.0.40
codegen_flags: <defaults>
</compile_context>

<pallas_src>
import jax
import jax.numpy as jnp
from jax import lax
from jax.experimental import pallas as pl
from jax.experimental.pallas import tpu as pltpu

# ----------------------------- model sizes (small) -----------------------------
VOCAB_SIZE = 50
EMBED_DIM = 16
HIDDEN_DIM = 32
NUM_CLASSES = 8
SEQ_LEN = 8

BATCH = 16            # sequences per call
BATCH_BLOCK = 8       # sequences per grid step (one vreg of hidden state)
VOCAB_PAD = 64        # vocab padded for aligned one-hot matmul
C_PAD = 128           # classes padded to a full lane width for an unmasked store


# --------------------------------- Pallas kernel --------------------------------
def rnn_classifier_kernel(tok_ref,                       # (B_blk*L, 1) int32, t-major rows
                          embp_ref, whh_ref, b_ref, wout_ref, bout_ref,
                          o_ref):                        # (B_blk, C_PAD) f32
    rows = BATCH_BLOCK * SEQ_LEN

    # 1) Fused embedding gather + input projection as ONE MXU matmul:
    #    one_hot (rows, V_pad) @ emb_proj (V_pad, H). Token rows are ordered
    #    r = t*B_blk + b, so each timestep's batch rows form one aligned (8, H) tile.
    tok = tok_ref[...]                                                     # (rows, 1)
    vocab_ids = lax.broadcasted_iota(jnp.int32, (rows, VOCAB_PAD), 1)
    one_hot = jnp.where(tok == vocab_ids, 1.0, 0.0).astype(jnp.bfloat16)   # exact 0/1
    prex = jnp.dot(one_hot, embp_ref[...],
                   preferred_element_type=jnp.float32) + b_ref[...]        # (rows, H) f32

    # 2) Serial Elman recurrence, batched over B_blk sequences. h stays in vregs;
    #    the loop is fully unrolled with static tile-aligned slices of prex.
    whh = whh_ref[...]                                                     # (H, H) bf16
    h = jnp.zeros((BATCH_BLOCK, HIDDEN_DIM), jnp.float32)
    for t in range(SEQ_LEN):
        x_t = prex[t * BATCH_BLOCK:(t + 1) * BATCH_BLOCK, :]               # (B_blk, H)
        h = jnp.tanh(x_t + jnp.dot(h.astype(jnp.bfloat16), whh,
                                   preferred_element_type=jnp.float32))

    # TODO(synk): F.dropout (training=True by default in the reference forward) is
    # implemented as identity (eval semantics) to keep the kernel deterministic.

    # 3) Linear -> ReLU -> log_softmax over the NUM_CLASSES real lanes; padded lanes
    #    are masked to -1e30 so they vanish from the softmax, output stays lane-dense.
    z = jnp.dot(h.astype(jnp.bfloat16), wout_ref[...],
                preferred_element_type=jnp.float32) + bout_ref[...]        # (B_blk, C_PAD)
    z = jnp.maximum(z, 0.0)
    col = lax.broadcasted_iota(jnp.int32, (BATCH_BLOCK, C_PAD), 1)
    z = jnp.where(col < NUM_CLASSES, z, jnp.float32(-1e30))
    m = jnp.max(z, axis=-1, keepdims=True)
    e = jnp.exp(z - m)
    o_ref[...] = (z - m) - jnp.log(jnp.sum(e, axis=-1, keepdims=True))


# ------------------------------------ wrapper ------------------------------------
def rnn_classifier_forward(seq_batch, emb_proj, whh, b, wout_pad, bout_pad):
    """seq_batch: (B, L) int32 tokens. Returns (B, NUM_CLASSES) f32 log-probs."""
    bsz, seq_len = seq_batch.shape
    assert seq_len == SEQ_LEN and bsz % BATCH_BLOCK == 0
    nb = bsz // BATCH_BLOCK
    rows = BATCH_BLOCK * SEQ_LEN

    # Layout plumbing (tiny, outside the kernel): rows ordered (block, t, b) so the
    # kernel's per-timestep slice is one contiguous 8-row tile.
    tok = (seq_batch.astype(jnp.int32)
           .reshape(nb, BATCH_BLOCK, SEQ_LEN)
           .transpose(0, 2, 1)
           .reshape(nb * rows, 1))

    def whole(shape):   # whole-array, constant index_map -> DMA'd once, VMEM-resident
        return pl.BlockSpec(shape, lambda i: (0,) * len(shape))

    out = pl.pallas_call(
        rnn_classifier_kernel,
        out_shape=jax.ShapeDtypeStruct((bsz, C_PAD), jnp.float32),
        grid=(nb,),
        in_specs=[
            pl.BlockSpec((rows, 1), lambda i: (i, 0)),      # per-block token column
            whole(emb_proj.shape), whole(whh.shape), whole(b.shape),
            whole(wout_pad.shape), whole(bout_pad.shape),
        ],
        out_specs=pl.BlockSpec((BATCH_BLOCK, C_PAD), lambda i: (i, 0)),
        compiler_params=pltpu.CompilerParams(dimension_semantics=("parallel",)),
    )(tok, emb_proj, whh, b, wout_pad, bout_pad)
    return out[:, :NUM_CLASSES]


# ------------------------------- parameter setup --------------------------------
def init_params(key):
    """PyTorch-equivalent parameters, stored (in, out) so every matmul is x @ W."""
    k_emb, k_wih, k_whh, k_bih, k_bhh, k_wo, k_bo = jax.random.split(key, 7)
    inv_h = 1.0 / jnp.sqrt(jnp.float32(HIDDEN_DIM))

    embedding = jax.random.normal(k_emb, (VOCAB_SIZE, EMBED_DIM), jnp.float32)
    embedding = embedding.at[0].set(0.0)  # padding_idx=0 -> zero vector

    w_ih = jax.random.uniform(k_wih, (EMBED_DIM, HIDDEN_DIM), jnp.float32, -inv_h, inv_h)
    w_hh = jax.random.uniform(k_whh, (HIDDEN_DIM, HIDDEN_DIM), jnp.float32, -inv_h, inv_h)
    b_ih = jax.random.uniform(k_bih, (HIDDEN_DIM,), jnp.float32, -inv_h, inv_h)
    b_hh = jax.random.uniform(k_bhh, (HIDDEN_DIM,), jnp.float32, -inv_h, inv_h)
    w_out = jax.random.uniform(k_wo, (HIDDEN_DIM, NUM_CLASSES), jnp.float32, -inv_h, inv_h)
    b_out = jax.random.uniform(k_bo, (NUM_CLASSES,), jnp.float32, -inv_h, inv_h)
    return embedding, w_ih, w_hh, b_ih, b_hh, w_out, b_out


def prepare_params(embedding, w_ih, w_hh, b_ih, b_hh, w_out, b_out):
    """Parameter-only preprocessing, amortized across calls."""
    # Fold embedding with the input projection: row 0 of embedding is zero
    # (padding_idx=0), so row 0 of emb_proj stays zero -> semantics preserved.
    emb_proj = embedding @ w_ih                                        # (V, H) f32
    emb_proj = jnp.pad(emb_proj, ((0, VOCAB_PAD - VOCAB_SIZE), (0, 0)))
    b = (b_ih + b_hh).reshape(1, HIDDEN_DIM).astype(jnp.float32)       # combined bias
    wout_pad = jnp.pad(w_out, ((0, 0), (0, C_PAD - NUM_CLASSES)))
    bout_pad = jnp.pad(b_out.reshape(1, NUM_CLASSES), ((0, 0), (0, C_PAD - NUM_CLASSES)))
    return (emb_proj.astype(jnp.bfloat16), w_hh.astype(jnp.bfloat16), b,
            wout_pad.astype(jnp.bfloat16), bout_pad.astype(jnp.float32))


# ------------------------------ pure-JAX reference -------------------------------
def reference_forward(seq_batch, embedding, w_ih, w_hh, b_ih, b_hh, w_out, b_out):
    """Mirrors the kernel math exactly (bf16 MXU operands, f32 accumulation)."""
    bf = lambda x: x.astype(jnp.bfloat16).astype(jnp.float32)
    emb_proj = bf(embedding @ w_ih)                    # (V, H)
    whh, wout = bf(w_hh), bf(w_out)
    bias = b_ih + b_hh
    x = emb_proj[seq_batch] + bias                     # (B, L, H)
    h = jnp.zeros((seq_batch.shape[0], HIDDEN_DIM), jnp.float32)
    for t in range(SEQ_LEN):
        h = jnp.tanh(x[:, t, :] + bf(h) @ whh)
    z = jnp.maximum(bf(h) @ wout + b_out, 0.0)
    return jax.nn.log_softmax(z, axis=-1)


# ------------------------------------- main --------------------------------------
if __name__ == "__main__":
    key = jax.random.PRNGKey(0)
    k_params, k_seq = jax.random.split(key)

    raw_params = init_params(k_params)
    prepped = prepare_params(*raw_params)

    # (BATCH, L) token sequences, including padding tokens (0).
    seq_batch = jax.random.randint(k_seq, (BATCH, SEQ_LEN), 0, VOCAB_SIZE, dtype=jnp.int32)
    seq_batch = seq_batch.at[:, -1].set(0)   # trailing padding on every sequence
    seq_batch = seq_batch.at[0].set(0)       # one fully padded sequence

    scores = rnn_classifier_forward(seq_batch, *prepped)
    scores = jax.block_until_ready(scores)

    assert scores.shape == (BATCH, NUM_CLASSES)
    assert bool(jnp.all(jnp.isfinite(scores)))
    # log_softmax rows must (approximately) sum to 1 after exp.
    assert bool(jnp.allclose(jnp.sum(jnp.exp(scores), axis=1), 1.0, atol=1e-5))
    # Match the pure-JAX reference of the same forward (same bf16 MXU rounding).
    ref = reference_forward(seq_batch, *raw_params)
    assert bool(jnp.allclose(scores, ref, atol=2e-3, rtol=2e-3))

    print("KERNEL_OK")
</pallas_src>

<mosaic_0001>
module attributes {stable_mosaic.version = 11 : i64} {
  func.func @rnn_classifier_kernel(%arg0: i32, %arg1: memref<64x1xi32, #tpu.memory_space<vmem>>, %arg2: memref<64x32xbf16, #tpu.memory_space<vmem>>, %arg3: memref<32x32xbf16, #tpu.memory_space<vmem>>, %arg4: memref<1x32xf32, #tpu.memory_space<vmem>>, %arg5: memref<32x128xbf16, #tpu.memory_space<vmem>>, %arg6: memref<1x128xf32, #tpu.memory_space<vmem>>, %arg7: memref<8x128xf32, #tpu.memory_space<vmem>>) attributes {dimension_semantics = [#tpu.dimension_semantics<parallel>], iteration_bounds = array<i64: 2>, scalar_prefetch = 0 : i64, scratch_operands = 0 : i64, tpu.core_type = #tpu.core_type<tc>, window_params = [{transform_indices = @transform_0, window_bounds = array<i64: 64, 1>}, {pipeline_mode = #tpu.pipeline_mode<synchronous>, transform_indices = @transform_1, window_bounds = array<i64: 64, 32>}, {pipeline_mode = #tpu.pipeline_mode<synchronous>, transform_indices = @transform_2, window_bounds = array<i64: 32, 32>}, {pipeline_mode = #tpu.pipeline_mode<synchronous>, transform_indices = @transform_3, window_bounds = array<i64: 1, 32>}, {pipeline_mode = #tpu.pipeline_mode<synchronous>, transform_indices = @transform_4, window_bounds = array<i64: 32, 128>}, {pipeline_mode = #tpu.pipeline_mode<synchronous>, transform_indices = @transform_5, window_bounds = array<i64: 1, 128>}, {transform_indices = @transform_6, window_bounds = array<i64: 8, 128>}]} {
    %c0 = arith.constant 0 : index
    %c0_0 = arith.constant 0 : index
    %0 = vector.load %arg1[%c0, %c0_0] : memref<64x1xi32, #tpu.memory_space<vmem>>, vector<64x1xi32>
    %1 = tpu.iota {dimensions = array<i32: 1>} : vector<64x64xi32>
    %2 = vector.broadcast %0 : vector<64x1xi32> to vector<64x64xi32>
    %3 = arith.cmpi eq, %2, %1 : vector<64x64xi32>
    %cst = arith.constant 1.000000e+00 : f32
    %cst_1 = arith.constant 0.000000e+00 : f32
    %4 = vector.broadcast %cst : f32 to vector<64x64xf32>
    %5 = vector.broadcast %cst_1 : f32 to vector<64x64xf32>
    %6 = arith.select %3, %4, %5 : vector<64x64xi1>, vector<64x64xf32>
    %7 = arith.truncf %6 : vector<64x64xf32> to vector<64x64xbf16>
    %c0_2 = arith.constant 0 : index
    %c0_3 = arith.constant 0 : index
    %8 = vector.load %arg2[%c0_2, %c0_3] : memref<64x32xbf16, #tpu.memory_space<vmem>>, vector<64x32xbf16>
    %cst_4 = arith.constant dense<0.000000e+00> : vector<64x32xf32>
    %9 = tpu.matmul %7, %8, %cst_4 {dimension_numbers = #tpu.dot_dimension_numbers<[1], [0], [0], [1], [0, 0, 1, 1], [], []>} : vector<64x64xbf16>, vector<64x32xbf16>, vector<64x32xf32> -> vector<64x32xf32>
    %c0_5 = arith.constant 0 : index
    %c0_6 = arith.constant 0 : index
    %10 = vector.load %arg4[%c0_5, %c0_6] : memref<1x32xf32, #tpu.memory_space<vmem>>, vector<1x32xf32>
    %11 = vector.broadcast %10 : vector<1x32xf32> to vector<64x32xf32>
    %12 = arith.addf %9, %11 : vector<64x32xf32>
    %c0_7 = arith.constant 0 : index
    %c0_8 = arith.constant 0 : index
    %13 = vector.load %arg3[%c0_7, %c0_8] : memref<32x32xbf16, #tpu.memory_space<vmem>>, vector<32x32xbf16>
    %cst_9 = arith.constant 0.000000e+00 : f32
    %14 = vector.broadcast %cst_9 : f32 to vector<8x32xf32>
    %15 = vector.extract_strided_slice %12 {offsets = [0, 0], sizes = [8, 32], strides = [1, 1]} : vector<64x32xf32> to vector<8x32xf32>
    %16 = arith.truncf %14 : vector<8x32xf32> to vector<8x32xbf16>
    %cst_10 = arith.constant dense<0.000000e+00> : vector<8x32xf32>
    %17 = tpu.matmul %16, %13, %cst_10 {dimension_numbers = #tpu.dot_dimension_numbers<[1], [0], [0], [1], [0, 0, 1, 1], [], []>} : vector<8x32xbf16>, vector<32x32xbf16>, vector<8x32xf32> -> vector<8x32xf32>
    %18 = arith.addf %15, %17 : vector<8x32xf32>
    %19 = math.tanh %18 : vector<8x32xf32>
    %20 = vector.extract_strided_slice %12 {offsets = [8, 0], sizes = [8, 32], strides = [1, 1]} : vector<64x32xf32> to vector<8x32xf32>
    %21 = arith.truncf %19 : vector<8x32xf32> to vector<8x32xbf16>
    %cst_11 = arith.constant dense<0.000000e+00> : vector<8x32xf32>
    %22 = tpu.matmul %21, %13, %cst_11 {dimension_numbers = #tpu.dot_dimension_numbers<[1], [0], [0], [1], [0, 0, 1, 1], [], []>} : vector<8x32xbf16>, vector<32x32xbf16>, vector<8x32xf32> -> vector<8x32xf32>
    %23 = arith.addf %20, %22 : vector<8x32xf32>
    %24 = math.tanh %23 : vector<8x32xf32>
    %25 = vector.extract_strided_slice %12 {offsets = [16, 0], sizes = [8, 32], strides = [1, 1]} : vector<64x32xf32> to vector<8x32xf32>
    %26 = arith.truncf %24 : vector<8x32xf32> to vector<8x32xbf16>
    %cst_12 = arith.constant dense<0.000000e+00> : vector<8x32xf32>
    %27 = tpu.matmul %26, %13, %cst_12 {dimension_numbers = #tpu.dot_dimension_numbers<[1], [0], [0], [1], [0, 0, 1, 1], [], []>} : vector<8x32xbf16>, vector<32x32xbf16>, vector<8x32xf32> -> vector<8x32xf32>
    %28 = arith.addf %25, %27 : vector<8x32xf32>
    %29 = math.tanh %28 : vector<8x32xf32>
    %30 = vector.extract_strided_slice %12 {offsets = [24, 0], sizes = [8, 32], strides = [1, 1]} : vector<64x32xf32> to vector<8x32xf32>
    %31 = arith.truncf %29 : vector<8x32xf32> to vector<8x32xbf16>
    %cst_13 = arith.constant dense<0.000000e+00> : vector<8x32xf32>
    %32 = tpu.matmul %31, %13, %cst_13 {dimension_numbers = #tpu.dot_dimension_numbers<[1], [0], [0], [1], [0, 0, 1, 1], [], []>} : vector<8x32xbf16>, vector<32x32xbf16>, vector<8x32xf32> -> vector<8x32xf32>
    %33 = arith.addf %30, %32 : vector<8x32xf32>
    %34 = math.tanh %33 : vector<8x32xf32>
    %35 = vector.extract_strided_slice %12 {offsets = [32, 0], sizes = [8, 32], strides = [1, 1]} : vector<64x32xf32> to vector<8x32xf32>
    %36 = arith.truncf %34 : vector<8x32xf32> to vector<8x32xbf16>
    %cst_14 = arith.constant dense<0.000000e+00> : vector<8x32xf32>
    %37 = tpu.matmul %36, %13, %cst_14 {dimension_numbers = #tpu.dot_dimension_numbers<[1], [0], [0], [1], [0, 0, 1, 1], [], []>} : vector<8x32xbf16>, vector<32x32xbf16>, vector<8x32xf32> -> vector<8x32xf32>
    %38 = arith.addf %35, %37 : vector<8x32xf32>
    %39 = math.tanh %38 : vector<8x32xf32>
    %40 = vector.extract_strided_slice %12 {offsets = [40, 0], sizes = [8, 32], strides = [1, 1]} : vector<64x32xf32> to vector<8x32xf32>
    %41 = arith.truncf %39 : vector<8x32xf32> to vector<8x32xbf16>
    %cst_15 = arith.constant dense<0.000000e+00> : vector<8x32xf32>
    %42 = tpu.matmul %41, %13, %cst_15 {dimension_numbers = #tpu.dot_dimension_numbers<[1], [0], [0], [1], [0, 0, 1, 1], [], []>} : vector<8x32xbf16>, vector<32x32xbf16>, vector<8x32xf32> -> vector<8x32xf32>
    %43 = arith.addf %40, %42 : vector<8x32xf32>
    %44 = math.tanh %43 : vector<8x32xf32>
    %45 = vector.extract_strided_slice %12 {offsets = [48, 0], sizes = [8, 32], strides = [1, 1]} : vector<64x32xf32> to vector<8x32xf32>
    %46 = arith.truncf %44 : vector<8x32xf32> to vector<8x32xbf16>
    %cst_16 = arith.constant dense<0.000000e+00> : vector<8x32xf32>
    %47 = tpu.matmul %46, %13, %cst_16 {dimension_numbers = #tpu.dot_dimension_numbers<[1], [0], [0], [1], [0, 0, 1, 1], [], []>} : vector<8x32xbf16>, vector<32x32xbf16>, vector<8x32xf32> -> vector<8x32xf32>
    %48 = arith.addf %45, %47 : vector<8x32xf32>
    %49 = math.tanh %48 : vector<8x32xf32>
    %50 = vector.extract_strided_slice %12 {offsets = [56, 0], sizes = [8, 32], strides = [1, 1]} : vector<64x32xf32> to vector<8x32xf32>
    %51 = arith.truncf %49 : vector<8x32xf32> to vector<8x32xbf16>
    %cst_17 = arith.constant dense<0.000000e+00> : vector<8x32xf32>
    %52 = tpu.matmul %51, %13, %cst_17 {dimension_numbers = #tpu.dot_dimension_numbers<[1], [0], [0], [1], [0, 0, 1, 1], [], []>} : vector<8x32xbf16>, vector<32x32xbf16>, vector<8x32xf32> -> vector<8x32xf32>
    %53 = arith.addf %50, %52 : vector<8x32xf32>
    %54 = math.tanh %53 : vector<8x32xf32>
    %55 = arith.truncf %54 : vector<8x32xf32> to vector<8x32xbf16>
    %c0_18 = arith.constant 0 : index
    %c0_19 = arith.constant 0 : index
    %56 = vector.load %arg5[%c0_18, %c0_19] : memref<32x128xbf16, #tpu.memory_space<vmem>>, vector<32x128xbf16>
    %cst_20 = arith.constant dense<0.000000e+00> : vector<8x128xf32>
    %57 = tpu.matmul %55, %56, %cst_20 {dimension_numbers = #tpu.dot_dimension_numbers<[1], [0], [0], [1], [0, 0, 1, 1], [], []>} : vector<8x32xbf16>, vector<32x128xbf16>, vector<8x128xf32> -> vector<8x128xf32>
    %c0_21 = arith.constant 0 : index
    %c0_22 = arith.constant 0 : index
    %58 = vector.load %arg6[%c0_21, %c0_22] : memref<1x128xf32, #tpu.memory_space<vmem>>, vector<1x128xf32>
    %59 = vector.broadcast %58 : vector<1x128xf32> to vector<8x128xf32>
    %60 = arith.addf %57, %59 : vector<8x128xf32>
    %cst_23 = arith.constant 0.000000e+00 : f32
    %61 = vector.broadcast %cst_23 : f32 to vector<8x128xf32>
    %62 = arith.maximumf %60, %61 : vector<8x128xf32>
    %63 = tpu.iota {dimensions = array<i32: 1>} : vector<8x128xi32>
    %c8_i32 = arith.constant 8 : i32
    %64 = vector.broadcast %c8_i32 : i32 to vector<8x128xi32>
    %65 = arith.cmpi slt, %63, %64 : vector<8x128xi32>
    %cst_24 = arith.constant -1.000000e+30 : f32
    %66 = vector.broadcast %cst_24 : f32 to vector<8x128xf32>
    %67 = arith.select %65, %62, %66 : vector<8x128xi1>, vector<8x128xf32>
    %cst_25 = arith.constant dense<0xFF800000> : vector<8xf32>
    %68 = vector.multi_reduction <maximumf>, %67, %cst_25 [1] : vector<8x128xf32> to vector<8xf32>
    %69 = vector.shape_cast %68 : vector<8xf32> to vector<8x1xf32>
    %70 = vector.broadcast %69 : vector<8x1xf32> to vector<8x128xf32>
    %71 = arith.subf %67, %70 : vector<8x128xf32>
    %72 = math.exp %71 : vector<8x128xf32>
    %73 = vector.broadcast %69 : vector<8x1xf32> to vector<8x128xf32>
    %74 = arith.subf %67, %73 : vector<8x128xf32>
    %cst_26 = arith.constant dense<0.000000e+00> : vector<8xf32>
    %75 = vector.multi_reduction <add>, %72, %cst_26 [1] : vector<8x128xf32> to vector<8xf32>
    %76 = vector.shape_cast %75 : vector<8xf32> to vector<8x1xf32>
    %77 = math.log %76 : vector<8x1xf32>
    %78 = vector.broadcast %77 : vector<8x1xf32> to vector<8x128xf32>
    %79 = arith.subf %74, %78 : vector<8x128xf32>
    %c0_27 = arith.constant 0 : index
    %c0_28 = arith.constant 0 : index
    %80 = vector.load %arg7[%c0_27, %c0_28] : memref<8x128xf32, #tpu.memory_space<vmem>>, vector<8x128xf32>
    tpu.vector_store %arg7[%c0_27, %c0_28], %79 {strides = array<i32>} : memref<8x128xf32, #tpu.memory_space<vmem>>, vector<8x128xf32>,
    return
  }
  func.func @transform_0(%arg0: i32) -> (i32, i32) {
    %c0_i32 = arith.constant 0 : i32
    %c0_i32_0 = arith.constant 0 : i32
    return %arg0, %c0_i32 : i32, i32
  }
  func.func @transform_1(%arg0: i32) -> (i32, i32) {
    %c0_i32 = arith.constant 0 : i32
    %c0_i32_0 = arith.constant 0 : i32
    %c0_i32_1 = arith.constant 0 : i32
    return %c0_i32, %c0_i32_0 : i32, i32
  }
  func.func @transform_2(%arg0: i32) -> (i32, i32) {
    %c0_i32 = arith.constant 0 : i32
    %c0_i32_0 = arith.constant 0 : i32
    %c0_i32_1 = arith.constant 0 : i32
    return %c0_i32, %c0_i32_0 : i32, i32
  }
  func.func @transform_3(%arg0: i32) -> (i32, i32) {
    %c0_i32 = arith.constant 0 : i32
    %c0_i32_0 = arith.constant 0 : i32
    %c0_i32_1 = arith.constant 0 : i32
    return %c0_i32, %c0_i32_0 : i32, i32
  }
  func.func @transform_4(%arg0: i32) -> (i32, i32) {
    %c0_i32 = arith.constant 0 : i32
    %c0_i32_0 = arith.constant 0 : i32
    %c0_i32_1 = arith.constant 0 : i32
    return %c0_i32, %c0_i32_0 : i32, i32
  }
  func.func @transform_5(%arg0: i32) -> (i32, i32) {
    %c0_i32 = arith.constant 0 : i32
    %c0_i32_0 = arith.constant 0 : i32
    %c0_i32_1 = arith.constant 0 : i32
    return %c0_i32, %c0_i32_0 : i32, i32
  }
  func.func @transform_6(%arg0: i32) -> (i32, i32) {
    %c0_i32 = arith.constant 0 : i32
    %c0_i32_0 = arith.constant 0 : i32
    return %arg0, %c0_i32 : i32, i32
  }
}

</mosaic_0001>

<bundles_post_ra>
// kernel: tpu_custom_call.1
= control target key start
LH: loop header
LB: loop body
LE: loop exit
PB: predicated region body
PF: predicated region fallthrough
CT: control target
= control target key end

     0   :  { %11 = vsyncpa [#allocation3], 0  ;;  %s1518_s0 = inlined_call_operand.vmem [shape: s32[128,1], index: 0, kind: input, shape index: {}]   ;;  %s1519_s1 = inlined_call_operand.vmem [shape: bf16[64,32], index: 1, kind: input, shape index: {}]   ;;  %s1520_s2 = inlined_call_operand.vmem [shape: bf16[32,32], index: 2, kind: input, shape index: {}]   ;;  %s1521_s3 = inlined_call_operand.vmem [shape: f32[1,32], index: 3, kind: input, shape index: {}]   ;;  %s1522_s4 = inlined_call_operand.vmem [shape: bf16[32,128], index: 4, kind: input, shape index: {}]   ;;  %s1523_s5 = inlined_call_operand.vmem [shape: f32[1,128], index: 5, kind: input, shape index: {}]   ;;  %s1524_s6 = inlined_call_operand.hbm [shape: f32[16,128], index: 6, kind: output, shape index: {}]  }
   0x1   :  { %13 = vsyncpa [#allocation3 + $0x1], 0  ;;  %s1293_s21 = smov 0   ;;  %s1295_s22 = smov 0  }
   0x2   :  { %s1297_s23 = smov 0   ;;  %s1299_s24 = smov 0  }
   0x3 LB: > { %s1314_s25 = sadd.s32 4294967295, %s1252_s24   ;;  %s962_s26 = sadd.s32 4294967294, %s1252_s24   ;;  %s1252_s24 = sphi %s1299_s24, %s1530_s24   ;;  %s1248_s23 = sphi %s1297_s23, %s1529_s23   ;;  %s1244_s22 = sphi %s1295_s22, %s1528_s22   ;;  %s1240_s21 = sphi %s1293_s21, %s1527_s21  }
   0x4   : > { %s1318_s27 = sadd.s32 1, %s1252_s24   ;;  %s157_s28 = sadd.s32 1, %s1248_s23 }
   0x5   : > { %s154_s29 = ssub.s32 %s1252_s24, %s1318_s27  ;;  %p167_p0 = scmp.ne.s32.totalorder %s1248_s23, %s1244_s22 }
   0x6   : > { %p155_p1 = scmp.eq.s32.totalorder %s154_s29, 0  ;;  %p168_p2 = scmp.eq.s32.totalorder %s1314_s25, 1 }
   0x7   : > { %p173_p3 = scmp.ne.s32.totalorder %s1244_s22, %s1240_s21  ;;  %p174_p4 = scmp.eq.s32.totalorder %s962_s26, 1 }
   0x8   : > { %s1329_s30 = scalar_select %p155_p1, %s1248_s23, %s157_s28  }
   0x9   : > { %p1331_p5 = por %p168_p2, %p167_p0  ;;  %p1335_p6 = por %p174_p4, %p173_p3 }
   0xa   : > { %p965_p7 = scmp.ge.s32.totalorder %s1252_s24, 1  ;;  %p216_p8 = scmp.lt.s32.totalorder %s1252_s24, 3 }
   0xc   : > { %p217_p9 = pnand %p965_p7, %p216_p8 }
   0xd   : > { %s967_s9 = sshll.u32 (!%p217_p9), %s1314_s25, 3  ;;  %v1254_v0 = vmov (!%p217_p9), 0   ;;  %v1162_v1 = vld [vmem:[%s1519_s1] sm:$0xff] (!%p217_p9)   ;;  %v1163_v2 = vld [vmem:[%s1519_s1 + $0x8] sm:$0xff] (!%p217_p9)   ;;  %v1255_v3 = vmov (!%p217_p9), 0.0   ;;  %v1164_v8 = vld [vmem:[%s1519_s1 + $0x10] sm:$0xff] (!%p217_p9)   ;;  %v261_v16 = vlaneseq (!%p217_p9) }
   0xe   : > { %220 = sbr.rel (%p217_p9) target bundleno = 2526 (0x9de), region = 44  ;;  %1161 = vset.pattern.permute.xlu1 (!%p217_p9), %v1254_v0  ;;  %1160 = vset.pattern.permute.xlu0 (!%p217_p9), %v1254_v0  ;;  %p247_p10 = scmp.lt.s32.totalorder (!%p217_p9), %s967_s9, 15  ;;  %v1358_v9 = vld [vmem:[%s1520_s2] sm:$0xff] (!%p217_p9)   ;;  %v1166_v10 = vld [vmem:[%s1519_s1 + $0x18] sm:$0xff] (!%p217_p9)   ;;  %v1367_v13 = vld [vmem:[%s1520_s2 + $0x8] sm:$0xff] (!%p217_p9)   ;;  %vm1256_vm0 = vmmov (!%p217_p9), 0  }
   0xf   : > { %1030 = vmatprep.subr.bf16.mxu0 (!%p217_p9), %v1162_v1  ;;  %1046 = vmatprep.subr.bf16.mxu1 (!%p217_p9), %v1255_v3  ;;  %v1381_v17 = vand.u32 (!%p217_p9), 127, %v261_v16  ;;  %vm346_vm5 = vcmask (!%p217_p9), 523264   ;;  %v969_v42 = vld [vmem:[%s1521_s3] ss:$0 sm:$0xff] (!%p217_p9)  ;;  %vm440_vm10 = vcmask (!%p217_p9), 261120   ;;  %s243_s19 = sand.u32 (!%p217_p9), 1, %s1244_s22  }
  0x10   : > { %1031 = vmatpush3.bf16.msra.mxu0 (!%p217_p9), %v1162_v1  ;;  %1047 = vmatpush3.bf16.msra.mxu1 (!%p217_p9), %v1358_v9  ;;  %s966_s20 = sshll.u32 (!%p217_p9), %s243_s19, 3  ;;  %s992_s26 = sshll.u32 (!%p217_p9), %s1314_s25, 7 }
  0x11   : > { %1032 = vmatprep.subr.bf16.mxu0 (!%p217_p9), %v1163_v2  ;;  %1048 = vmatprep.subr.bf16.mxu1 (!%p217_p9), %v1255_v3  ;;  %vm876_vm11 = vcmp.lt.s32.totalorder (!%p217_p9), %v1381_v17, 8  ;;  %s245_s28 = scalar_lea.vmem (!%p217_p9), [#allocation2], %s966_s20  ;;  %s1476_s11 = scalar_lea.hbm (!%p217_p9), %s1524_s6, %s992_s26 }
  0x12   : > { %1050 = vmatprep.mubr.msk.bf16.mxu1 (!%p217_p9), %vm1256_vm0, %v1255_v3  ;;  %s903_s29 = sshll.u32 (!%p217_p9), %s245_s28, 4  ;;  %s890_s12 = scalar_lea.sflag (!%p217_p9), [#allocation3], %s243_s19  ;;  %s1478_s29 = int_to_ptr.vmem [resolvable:$true] %s903_s29 }
  0x13   : > { %s1190_s13 = scalar_lea.vmem (!%p217_p9), %s1478_s29, 128  ;;  %s1257_s25 = smov (!%p217_p9), [#allocation2]  }
  0x14   : > { %1033 = vmatpush3.bf16.msra.mxu0 (!%p217_p9), %v1163_v2  ;;  %1049 = vmatpush3.bf16.msra.mxu1 (!%p217_p9), %v1367_v13  ;;  %p1191_p11 = scmp.ne.s32.totalorder (!%p217_p9), %s1478_s29, %s1190_s13 }
  0x15   : > { %s1532_s9 = smov (!%p247_p10, %s967_s9), 15  ;;  %1034 = vmatprep.subr.bf16.mxu0 %v1164_v8  ;;  %1054 = vmatprep.subr.bf16.mxu1 %v1255_v3 }
  0x16   : > { %s968_s14 = sshll.u32 %s1532_s9, 3  ;;  %p1192_p12 = pnand %p1191_p11, %p1331_p5 }
  0x17   : > { %s250_s17 = scalar_lea.vmem %s1518_s0, %s968_s14  ;;  %1051 = vmatmul.mubr.bf16.vlgmr.msra.gmra.mrb[0].mxu1 %v1254_v0  ;;  %s1194_s14 = sshll.u32 %s1257_s25, 4  ;;  %s1195_s14 = int_to_ptr.vmem [resolvable:$false] %s1194_s14 }
  0x18   : > { %v255_v4 = vld [vmem:[%s250_s17 + $0x10] sm:$0xff]  ;;  %v253_v5 = vld [vmem:[%s250_s17] sm:$0xff]  ;;  %v256_v6 = vld [vmem:[%s250_s17 + $0x18] sm:$0xff]  ;;  %1035 = vmatpush3.bf16.msra.mxu0 %v1164_v8  ;;  %1055 = vmatpush3.bf16.msra.mxu1 %v1358_v9  ;;  %p1193_p13 = pneg %p1192_p12  ;;  %s1196_s15 = scalar_lea.vmem %s1195_s14, 256 }
  0x19   : > { %270 = vperm.xlu1 %1161, %v255_v4   ;;  %264 = vperm.xlu0 %1160, %v253_v5   ;;  %v254_v7 = vld [vmem:[%s250_s17 + $0x8] sm:$0xff]  ;;  %v257_v12 = vld [vmem:[%s250_s17 + $0x20] sm:$0xff]  ;;  %v260_v14 = vld [vmem:[%s250_s17 + $0x38] sm:$0xff]  ;;  %p1197_p0 = scmp.lt.s32.totalorder %s1478_s29, %s1195_s14  ;;  %p1198_p1 = scmp.lt.s32.totalorder %s1196_s15, %s1190_s13 }
  0x1a   : > { %v258_v11 = vld [vmem:[%s250_s17 + $0x28] sm:$0xff]  ;;  %1036 = vmatprep.subr.bf16.mxu0 %v1166_v10  ;;  %v259_v15 = vld [vmem:[%s250_s17 + $0x30] sm:$0xff]  ;;  %1058 = vmatprep.mubr.msk.bf16.mxu1 %vm1256_vm0, %v1255_v3 }
  0x1b   : > { %1056 = vmatprep.subr.bf16.mxu1 %v1255_v3  ;;  %p1199_p2 = por %p1198_p1, %p1197_p0 }
  0x1c   : > { %1037 = vmatpush3.bf16.msra.mxu0 %v1166_v10  ;;  %1057 = vmatpush3.bf16.msra.mxu1 %v1367_v13 }
  0x1d   : > { %273 = vperm.xlu1 %1161, %v256_v6   ;;  %267 = vperm.xlu0 %1160, %v254_v7   ;;  %p1200_p3 = pnand %p1199_p2, %p1193_p13 }
  0x1e   : > { %1070 = vmatprep.subr.bf16.mxu0 %v1255_v3  ;;  %1062 = vmatprep.subr.bf16.mxu1 %v1255_v3 }
  0x21   : > { %279 = vperm.xlu1 %1161, %v258_v11   ;;  %276 = vperm.xlu0 %1160, %v257_v12  }
  0x25   : > { %285 = vperm.xlu1 %1161, %v260_v14   ;;  %282 = vperm.xlu0 %1160, %v259_v15  }
  0x98   : > { %v271_v18 = vpop.permute.xlu1 %270  ;;  %v265_v19 = vpop.permute.xlu0 %264 }
  0x99   : > { %vm289_vm1 = vcmp.eq.s32.totalorder %v271_v18, %v1381_v17  ;;  %vm287_vm2 = vcmp.eq.s32.totalorder %v265_v19, %v1381_v17 }
  0x9a   : > { %v297_v22 = vsel %vm289_vm1, 1.0, %v1255_v3  ;;  %v295_v23 = vsel %vm287_vm2, 1.0, %v1255_v3 }
  0x9c   : > { %v274_v20 = vpop.permute.xlu1 %273  ;;  %v268_v21 = vpop.permute.xlu0 %267 }
  0x9d   : > { %vm290_vm3 = vcmp.eq.s32.totalorder %v274_v20, %v1381_v17  ;;  %vm288_vm4 = vcmp.eq.s32.totalorder %v268_v21, %v1381_v17 }
  0x9e   : > { %v298_v24 = vsel %vm290_vm3, 1.0, %v1255_v3  ;;  %v296_v25 = vsel %vm288_vm4, 1.0, %v1255_v3 }
  0x9f   : > { %v304_v26 = vpack.c.bf16 %v298_v24, %v297_v22  ;;  %v303_v27 = vpack.c.bf16 %v296_v25, %v295_v23 }
  0xa0   : > { %v280_v28 = vpop.permute.xlu1 %279  ;;  %v277_v29 = vpop.permute.xlu0 %276 }
  0xa1   : > { %vm292_vm6 = vcmp.eq.s32.totalorder %v280_v28, %v1381_v17  ;;  %vm291_vm7 = vcmp.eq.s32.totalorder %v277_v29, %v1381_v17  ;;  %1038 = vmatprep.mubr.msk.bf16.mxu0 %vm346_vm5, %v303_v27 }
  0xa2   : > { %v300_v30 = vsel %vm292_vm6, 1.0, %v1255_v3  ;;  %v299_v31 = vsel %vm291_vm7, 1.0, %v1255_v3  ;;  %1039 = vmatmul.mubr.msk.bf16.vlgmr.msra.gmra.mrb[0].mxu0 %vm346_vm5, %v304_v26 }
  0xa3   : > { %v305_v32 = vpack.c.bf16 %v300_v30, %v299_v31  ;;  %1071 = vmatpush3.bf16.msra.mxu0 %v1358_v9 }
  0xa4   : > { %v286_v33 = vpop.permute.xlu1 %285  ;;  %v283_v34 = vpop.permute.xlu0 %282  ;;  %1072 = vmatprep.subr.bf16.mxu0 %v1255_v3 }
  0xa5   : > { %vm294_vm8 = vcmp.eq.s32.totalorder %v286_v33, %v1381_v17  ;;  %vm293_vm9 = vcmp.eq.s32.totalorder %v283_v34, %v1381_v17  ;;  %1042 = vmatprep.mubr.msk.bf16.mxu0 %vm346_vm5, %v305_v32 }
  0xa6   : > { %v302_v35 = vsel %vm294_vm8, 1.0, %v1255_v3  ;;  %v301_v36 = vsel %vm293_vm9, 1.0, %v1255_v3 }
  0xa7   : > { %v306_v37 = vpack.c.bf16 %v302_v35, %v301_v36  ;;  %1073 = vmatpush3.bf16.msra.mxu0 %v1367_v13 }
  0xa8   : > { %1086 = vmatprep.subr.bf16.mxu0 %v1255_v3 }
  0xaa   : > { %1043 = vmatmul.mubr.msk.bf16.gmra.mrb[4].mxu0 %vm346_vm5, %v306_v37 }
  0xab   : > { %1074 = vmatprep.mubr.msk.bf16.mxu0 %vm1256_vm0, %v1255_v3 }
  0xea   : > { %v478_v38 = vpop.f32.mrb[0].mxu1 }
  0xeb   : > { %v1052_v39 = vpop.f32.mrb[1].mxu1 }
  0xec   : > { %v481_v40 = vpop.f32.mrb[2].mxu1 }
  0xed   : > { %v1053_v41 = vpop.f32.mrb[3].mxu1 }
 0x175   : > { %v1040_v43 = vpop.f32.mrb[0].mxu0 }
 0x176   : > { %v402_v44 = vadd.f32 %v1040_v43, %v969_v42  ;;  %v393_v45 = vpop.f32.mrb[1].mxu0  ;;  %v1169_v43 = vld [vmem:[%s1522_s4 + $0x8] sm:$0xff]  }
 0x177   : > { %v394_v46 = vadd.f32 %v969_v42, %v393_v45  ;;  %v1041_v47 = vpop.f32.mrb[2].mxu0 }
 0x178   : > { %v405_v48 = vadd.f32 %v1041_v47, %v969_v42  ;;  %v396_v49 = vpop.f32.mrb[3].mxu0 }
 0x179   : > { %v484_v50 = vadd.f32 %v478_v38, %v394_v46  ;;  %v397_v51 = vadd.f32 %v969_v42, %v396_v49 }
 0x17b   : > { %1170 = vtanh.f32 %v484_v50 }
 0x17d   : > { %v1044_v52 = vpop.f32.mrb[4].mxu0 }
 0x17e   : > { %v1412_v53 = vadd.f32 %v1044_v52, %v969_v42  ;;  %v409_v54 = vpop.f32.mrb[5].mxu0 }
 0x17f   : > { %v410_v55 = vadd.f32 %v969_v42, %v409_v54  ;;  %v1045_v56 = vpop.f32.mrb[6].mxu0 }
 0x180   : > { %v1414_v57 = vadd.f32 %v1045_v56, %v969_v42  ;;  %v412_v58 = vpop.f32.mrb[7].mxu0 }
 0x181   : > { %v1416_v59 = vadd.f32 %v969_v42, %v412_v58  ;;  %v1168_v42 = vld [vmem:[%s1522_s4] sm:$0xff]  }
 0x185   : > { %v1171_v60 = vpop.eup %1170 }
 0x186   : > { %v486_v61 = vpack.c.bf16 %v1171_v60, %v1171_v60 }
 0x188   : > { %1059 = vmatmul.mubr.msk.bf16.vlgmr.msra.gmra.mrb[4].mxu1 %vm440_vm10, %v486_v61 }
 0x189   : > { %1063 = vmatpush3.bf16.msra.mxu1 %v1358_v9  ;;  %1066 = vmatprep.mubr.msk.bf16.mxu1 %vm1256_vm0, %v1255_v3 }
 0x18a   : > { %1064 = vmatprep.subr.bf16.mxu1 %v1255_v3 }
 0x18d   : > { %1065 = vmatpush3.bf16.msra.mxu1 %v1367_v13 }
 0x18e   : > { %1078 = vmatprep.subr.bf16.mxu1 %v1255_v3 }
 0x25b   : > { %v524_v62 = vpop.f32.mrb[4].mxu1 }
 0x25c   : > { %v530_v63 = vadd.f32 %v524_v62, %v397_v51  ;;  %v1060_v0 = vpop.f32.mrb[5].mxu1 }
 0x25d   : > { %v527_v1 = vpop.f32.mrb[6].mxu1 }
 0x25e   : > { %1172 = vtanh.f32 %v530_v63  ;;  %v1061_v2 = vpop.f32.mrb[7].mxu1 }
 0x268   : > { %v1173_v4 = vpop.eup %1172 }
 0x269   : > { %v532_v5 = vpack.c.bf16 %v1173_v4, %v1173_v4 }
 0x26b   : > { %1067 = vmatmul.mubr.msk.bf16.vlgmr.msra.gmra.mrb[8].mxu1 %vm440_vm10, %v532_v5 }
 0x26c   : > { %1079 = vmatpush3.bf16.msra.mxu1 %v1358_v9  ;;  %1082 = vmatprep.mubr.msk.bf16.mxu1 %vm1256_vm0, %v1255_v3 }
 0x26d   : > { %1080 = vmatprep.subr.bf16.mxu1 %v1255_v3 }
 0x270   : > { %1081 = vmatpush3.bf16.msra.mxu1 %v1367_v13 }
 0x271   : > { %1094 = vmatprep.subr.bf16.mxu1 %v1255_v3 }
 0x33e   : > { %v570_v6 = vpop.f32.mrb[8].mxu1 }
 0x33f   : > { %v576_v7 = vadd.f32 %v570_v6, %v402_v44  ;;  %v1068_v8 = vpop.f32.mrb[9].mxu1 }
 0x340   : > { %v573_v10 = vpop.f32.mrb[10].mxu1 }
 0x341   : > { %1174 = vtanh.f32 %v576_v7  ;;  %v1069_v11 = vpop.f32.mrb[11].mxu1 }
 0x34b   : > { %v1175_v12 = vpop.eup %1174 }
 0x34c   : > { %v578_v14 = vpack.c.bf16 %v1175_v12, %v1175_v12 }
 0x34e   : > { %1075 = vmatmul.mubr.msk.bf16.vlgmr.msra.gmra.mrb[8].mxu0 %vm440_vm10, %v578_v14 }
 0x34f   : > { %1087 = vmatpush3.bf16.msra.mxu0 %v1358_v9  ;;  %1090 = vmatprep.mubr.msk.bf16.mxu0 %vm1256_vm0, %v1255_v3 }
 0x350   : > { %1088 = vmatprep.subr.bf16.mxu0 %v1255_v3 }
 0x353   : > { %1089 = vmatpush3.bf16.msra.mxu0 %v1367_v13 }
 0x354   : > { %1102 = vmatprep.subr.bf16.mxu0 %v1255_v3 }
 0x421   : > { %v616_v15 = vpop.f32.mrb[8].mxu0 }
 0x422   : > { %v622_v16 = vadd.f32 %v616_v15, %v405_v48  ;;  %v1076_v18 = vpop.f32.mrb[9].mxu0 }
 0x423   : > { %v619_v19 = vpop.f32.mrb[10].mxu0 }
 0x424   : > { %1176 = vtanh.f32 %v622_v16  ;;  %v1077_v20 = vpop.f32.mrb[11].mxu0 }
 0x42e   : > { %v1177_v21 = vpop.eup %1176 }
 0x42f   : > { %v624_v22 = vpack.c.bf16 %v1177_v21, %v1177_v21 }
 0x431   : > { %1083 = vmatmul.mubr.msk.bf16.vlgmr.msra.gmra.mrb[12].mxu1 %vm440_vm10, %v624_v22 }
 0x432   : > { %1095 = vmatpush3.bf16.msra.mxu1 %v1358_v9  ;;  %1098 = vmatprep.mubr.msk.bf16.mxu1 %vm1256_vm0, %v1255_v3 }
 0x433   : > { %1096 = vmatprep.subr.bf16.mxu1 %v1255_v3 }
 0x436   : > { %1097 = vmatpush3.bf16.msra.mxu1 %v1367_v13 }
 0x437   : > { %1110 = vmatprep.subr.bf16.mxu1 %v1255_v3 }
 0x504   : > { %v662_v23 = vpop.f32.mrb[12].mxu1 }
 0x505   : > { %v668_v24 = vadd.f32 %v662_v23, %v410_v55  ;;  %v1084_v25 = vpop.f32.mrb[13].mxu1 }
 0x506   : > { %v665_v26 = vpop.f32.mrb[14].mxu1 }
 0x507   : > { %1178 = vtanh.f32 %v668_v24  ;;  %v1085_v27 = vpop.f32.mrb[15].mxu1 }
 0x511   : > { %v1179_v28 = vpop.eup %1178 }
 0x512   : > { %v670_v29 = vpack.c.bf16 %v1179_v28, %v1179_v28 }
 0x514   : > { %1091 = vmatmul.mubr.msk.bf16.vlgmr.msra.gmra.mrb[12].mxu0 %vm440_vm10, %v670_v29 }
 0x515   : > { %1103 = vmatpush3.bf16.msra.mxu0 %v1358_v9  ;;  %1106 = vmatprep.mubr.msk.bf16.mxu0 %vm1256_vm0, %v1255_v3 }
 0x516   : > { %1104 = vmatprep.subr.bf16.mxu0 %v1255_v3 }
 0x519   : > { %1105 = vmatpush3.bf16.msra.mxu0 %v1367_v13 }
 0x5e7   : > { %v708_v30 = vpop.f32.mrb[12].mxu0 }
 0x5e8   : > { %v714_v31 = vadd.f32 %v708_v30, %v1416_v59  ;;  %v1092_v32 = vpop.f32.mrb[13].mxu0 }
 0x5e9   : > { %v711_v33 = vpop.f32.mrb[14].mxu0 }
 0x5ea   : > { %1180 = vtanh.f32 %v714_v31  ;;  %v1093_v34 = vpop.f32.mrb[15].mxu0 }
 0x5f4   : > { %v1181_v35 = vpop.eup %1180 }
 0x5f5   : > { %v716_v36 = vpack.c.bf16 %v1181_v35, %v1181_v35 }
 0x5f7   : > { %1099 = vmatmul.mubr.msk.bf16.vlgmr.msra.gmra.mrb[16].mxu1 %vm440_vm10, %v716_v36 }
 0x5f8   : > { %1114 = vmatprep.mubr.msk.bf16.mxu1 %vm1256_vm0, %v1255_v3  ;;  %1111 = vmatpush3.bf16.msra.mxu1 %v1168_v42 }
 0x5f9   : > { %1112 = vmatprep.subr.bf16.mxu1 %v1255_v3  ;;  %v987_v3 = vld [vmem:[%s1523_s5] ss:$0 sm:$0xff] }
 0x5fc   : > { %1113 = vmatpush3.bf16.msra.mxu1 %v1169_v43 }
 0x6ca   : > { %v754_v9 = vpop.f32.mrb[16].mxu1 }
 0x6cb   : > { %v760_v37 = vadd.f32 %v754_v9, %v1412_v53  ;;  %v1100_v38 = vpop.f32.mrb[17].mxu1 }
 0x6cc   : > { %v757_v39 = vpop.f32.mrb[18].mxu1 }
 0x6cd   : > { %1182 = vtanh.f32 %v760_v37  ;;  %v1101_v13 = vpop.f32.mrb[19].mxu1 }
 0x6d7   : > { %v1183_v40 = vpop.eup %1182 }
 0x6d8   : > { %v762_v41 = vpack.c.bf16 %v1183_v40, %v1183_v40 }
 0x6da   : > { %1107 = vmatmul.mubr.msk.bf16.vlgmr.msra.gmra.mrb[16].mxu0 %vm440_vm10, %v762_v41 }
 0x7ad   : > { %v800_v44 = vpop.f32.mrb[16].mxu0 }
 0x7ae   : > { %v806_v45 = vadd.f32 %v800_v44, %v1414_v57  ;;  %v1108_v46 = vpop.f32.mrb[17].mxu0 }
 0x7af   : > { %v803_v47 = vpop.f32.mrb[18].mxu0 }
 0x7b0   : > { %1184 = vtanh.f32 %v806_v45  ;;  %v1109_v48 = vpop.f32.mrb[19].mxu0 }
 0x7ba   : > { %v1185_v49 = vpop.eup %1184 }
 0x7bb   : > { %v808_v50 = vpack.c.bf16 %v1185_v49, %v1185_v49 }
 0x7bd   : > { %1115 = vmatmul.mubr.msk.bf16.vlgmr.msra.gmra.mrb[20].mxu1 %vm440_vm10, %v808_v50 }
 0x890   : > { %v869_v51 = vpop.f32.mrb[20].mxu1 }
 0x891   : > { %v870_v52 = vadd.f32 %v987_v3, %v869_v51  ;;  %v1116_v53 = vpop.f32.mrb[21].mxu1 }
 0x892   : > { %v872_v54 = vpop.f32.mrb[22].mxu1 }
 0x893   : > { %v875_v55 = vmax.f32 %v870_v52, 0.0  ;;  %v1117_v56 = vpop.f32.mrb[23].mxu1 }
 0x895   : > { %v877_v57 = vsel %vm876_vm11, %v875_v55, -1e+30 }
 0x896   : > { %878 = vmax.xlane.f32.xlu0 %v877_v57 }
 0x923   : > { %v879_v58 = vpop.xlane.xlu0 %878 }
 0x924   : > { %v880_v59 = vsub.f32 %v877_v57, %v879_v58 }
 0x926   : > { %v881_v60 = vmul.f32 1.442695, %v880_v59 }
 0x928   : > { %1186 = vpow2.f32 %v881_v60 }
 0x932   : > { %v1187_v61 = vpop.eup %1186 }
 0x933   : > { %883 = vadd.xlane.f32.xlu1 %v1187_v61 }
 0x9c0   : > { %v884_v62 = vpop.xlane.xlu1 %883 }
 0x9c1   : > { %1188 = vlog2.f32 %v884_v62 }
 0x9cb   : > { %v1189_v63 = vpop.eup %1188 }
 0x9cc   : > { %v886_v17 = vmul.f32 0.6931472, %v1189_v63 }
 0x9ce   : > { %v887_v0 = vsub.f32 %v880_v59, %v886_v17 }
 0x9d0   : > { %888 = vst [vmem:[%s245_s28] sm:$0xff] %v887_v0 }
 0x9d1   : > { %1203 = shalt.err (!%p1200_p3)
}
 0x9d2   : > { %s1204_s16 = scalar_lea.hbm %s1476_s11, 128  ;;  %s1208_s19 = scalar_lea.hbm %s1524_s6, 256 }
 0x9d3   : > { %p1205_p4 = scmp.ne.s32.totalorder %s1476_s11, %s1204_s16  ;;  %p1209_p9 = scmp.lt.u32.totalorder %s1476_s11, %s1524_s6 }
 0x9d4   : > { %p1210_p10 = scmp.lt.u32.totalorder %s1208_s19, %s1204_s16  ;;  %p1212_p12 = scmp.lt.u32.totalorder %s1204_s16, %s1476_s11 }
 0x9d5   : > { %p1206_p7 = pnand %p1205_p4, %p1331_p5 }
 0x9d6   : > { %p1211_p11 = por %p1210_p10, %p1209_p9 }
 0x9d7   : > { %p1207_p8 = pneg %p1206_p7 }
 0x9d8   : > { %p1213_p13 = por %p1212_p12, %p1211_p11 }
 0x9da   : > { %p1214_p0 = pnand %p1213_p13, %p1207_p8 }
 0x9dc   : > { %1217 = shalt.err (!%p1214_p0)
}
 0x9dd   : > { %1118 = dma.vmem_to_hbm [thread:$0]  (%p1331_p5), %s1478_s29, 128, %s1476_s11, %s890_s12  }
 0x9de PF: > { %p1124_p1 = scmp.ge.s32.totalorder %s1252_s24, 2  ;;  %s915_s28 = sand.u32 1, %s1240_s21  }
 0x9df   : > { %s916_s9 = scalar_lea.sflag [#allocation3], %s915_s28 }
 0x9e0   : > { %p1121_p2 = pnand %p1124_p1, %p1335_p6 }
 0x9e2   : > { %1235 = dma.done.wait (!%p1121_p2), %s916_s9, 128  }
 0x9e3   : > { %1237 = vsyncadd (!%p1121_p2), %s916_s9, 4294967168  ;;  %p16_p3 = scmp.ge.s32.totalorder %s1318_s27, 4   ;;  %s1527_s21 = smov %s1244_s22 }
 0x9e4   : > { %s1528_s22 = smov %s1248_s23  ;;  %s1529_s23 = smov %s1329_s30 }
 0x9e5   : > { %s1530_s24 = smov %s1318_s27  ;;  %18 = sbr.rel (!%p16_p3) target bundleno = 3 (0x3), region = 79 }
 0x9ec   :  { %921 = vsyncpa [#allocation3], 1 }
 0x9ed   :  { %923 = vsyncpa [#allocation3 + $0x1], 1 }

</bundles_post_ra>
